<compile_context>
chip_gen: v5e
topology: v5e:2x2
jax: 0.10.0
libtpu: 0.0.40
codegen_flags: <defaults>
</compile_context>

<pallas_src>
import functools

import jax
import jax.numpy as jnp
from jax.experimental import pallas as pl
from jax.experimental.pallas import tpu as pltpu


# ---------------------------------------------------------------------------
# Pallas kernel: fused 1x1 conv (channel matmul) + bias + ReLU, lane-dense output
# ---------------------------------------------------------------------------

def _conv_relu_kernel(w_ref, b_ref, x_ref, o_ref):
    # w_ref: (Cout, Cin)     weight (constant index_map -> resident in VMEM)
    # b_ref: (Cout, 1)       f32 bias, broadcast over the lane axis
    # x_ref: (Cin, TILE_M)   channels on sublanes, flattened spatial on lanes
    # o_ref: (Cout, TILE_M)  lane-dense output tile
    acc = jnp.dot(w_ref[...], x_ref[...], preferred_element_type=jnp.float32)
    acc = acc + b_ref[...]
    o_ref[...] = jnp.maximum(acc, 0.0).astype(o_ref.dtype)


def _vmem_limit_bytes():
    """Per-generation scoped-VMEM limit: half of physical, capped at 64 MiB.
    (v5e/v6e: 128 MiB physical -> 64 MiB; v7x: 64 MiB physical -> 32 MiB.)"""
    default_cap = 128 * 1024 * 1024
    try:
        cap = getattr(pltpu.get_tpu_info(), "vmem_capacity_bytes", default_cap)
    except Exception:  # pragma: no cover - be robust off-TPU / older runtimes
        cap = default_cap
    return min(cap // 2, 64 * 1024 * 1024)


def _select_tile_m(HW, Cin, Cout, N, x_itemsize, out_itemsize, vmem_limit_bytes):
    """Pick the spatial (lane) tile size.

    HBM-bound kernel: pick the largest tile that fits ~half the scoped VMEM limit
    (double-buffered input + output tiles plus one f32 accumulator temp), but keep
    the total grid at >= ~8 steps when there is enough work so both v7x TensorCores
    are fed and prologue/epilogue amortize.  Non-full-extent tiles are multiples of
    128 so output stores are unmasked lane-dense vst.
    """
    # Bytes per lane of tile_m held in VMEM per grid step.
    per_lane_bytes = 2 * (Cin * x_itemsize + Cout * out_itemsize) + Cout * 4
    budget = max(vmem_limit_bytes // 2, 128 * per_lane_bytes)
    cap = max(128, (budget // per_lane_bytes) // 128 * 128)

    # Keep >= ~8 total grid steps (>= ~4 per TensorCore on v7x) when possible.
    target_total_steps = 8
    tiles_wanted = max(1, -(-target_total_steps // max(N, 1)))       # ceil
    tile_for_steps = -(-HW // tiles_wanted)                          # ceil
    tile_for_steps = max(128, ((tile_for_steps + 127) // 128) * 128)

    tile_m = min(cap, tile_for_steps)
    if HW <= tile_m:
        return HW          # full-extent block: always layout-legal
    return tile_m          # multiple of 128; ragged last tile is masked by Pallas


def pointwise_conv_relu(x, w, b, *, compute_dtype=None):
    """1x1 Conv2d + ReLU on NCHW input via a single tiled Pallas call.

    x: (N, Cin, H, W), w: (Cout, Cin, 1, 1), b: (Cout,) -> (N, Cout, H, W)
    compute_dtype: optional narrower dtype (e.g. jnp.bfloat16) for x/w to halve the
    dominant HBM read traffic; the MXU still accumulates in f32 and bias/ReLU run
    on the f32 accumulator.
    """
    N, Cin, H, W = x.shape
    Cout = w.shape[0]
    HW = H * W
    out_dtype = x.dtype

    # Free reshapes: channels stay on the sublane axis, flattened spatial on lanes.
    xm = x.reshape(N, Cin, HW)
    wm = w.reshape(Cout, Cin)
    bm = b.astype(jnp.float32).reshape(Cout, 1)
    if compute_dtype is not None:
        xm = xm.astype(compute_dtype)
        wm = wm.astype(compute_dtype)

    vmem_limit = _vmem_limit_bytes()
    tile_m = _select_tile_m(
        HW, Cin, Cout, N,
        x_itemsize=xm.dtype.itemsize,
        out_itemsize=jnp.dtype(out_dtype).itemsize,
        vmem_limit_bytes=vmem_limit,
    )
    grid = (N, pl.cdiv(HW, tile_m))

    ym = pl.pallas_call(
        _conv_relu_kernel,
        grid=grid,
        out_shape=jax.ShapeDtypeStruct((N, Cout, HW), out_dtype),
        in_specs=[
            pl.BlockSpec((Cout, Cin), lambda n, m: (0, 0)),             # weight (resident)
            pl.BlockSpec((Cout, 1), lambda n, m: (0, 0)),               # bias   (resident)
            pl.BlockSpec((None, Cin, tile_m), lambda n, m: (n, 0, m)),  # x tile
        ],
        out_specs=pl.BlockSpec((None, Cout, tile_m), lambda n, m: (n, 0, m)),
        compiler_params=pltpu.CompilerParams(
            dimension_semantics=("parallel", "parallel"),
            vmem_limit_bytes=vmem_limit,
        ),
    )(wm, bm, xm)

    return ym.reshape(N, Cout, H, W)


# ---------------------------------------------------------------------------
# Pad / crop helpers (pure data movement -> plain XLA for the generic path)
# ---------------------------------------------------------------------------

def pad_to_multiple(x, multiple, center=True):
    """Zero-pad H, W up to the next multiple.  Returns (x_pad, pad_amt) with
    pad_amt = (w_lo, w_hi, h_lo, h_hi) (F.pad order)."""
    N, C, H, W = x.shape
    ph = (-H) % multiple
    pw = (-W) % multiple
    if center:
        pad_amt = (pw // 2, pw - pw // 2, ph // 2, ph - ph // 2)
    else:
        pad_amt = (0, pw, 0, ph)
    wl, wr, hl, hr = pad_amt
    x_pad = jnp.pad(x, ((0, 0), (0, 0), (hl, hr), (wl, wr)))
    return x_pad, pad_amt


def crop_tensor(y, pad_amt):
    wl, wr, hl, hr = pad_amt
    _, _, Hp, Wp = y.shape
    return y[:, :, hl:Hp - hr, wl:Wp - wr]


# ---------------------------------------------------------------------------
# PadCropModule.forward equivalents
# ---------------------------------------------------------------------------

def pad_crop_forward_generic(x, model_fn, multiple, center=True):
    """Faithful generic forward: pad -> model -> crop (handles tuple outputs).
    # TODO(synk): for spatially-extended inner models, fold pad/crop into the inner
    # kernel's BlockSpec index_map (offset block index by pad, zero-fill halo blocks
    # via pl.when) instead of materializing jnp.pad + slice in HBM."""
    x_pad, pad_amt = pad_to_multiple(x, multiple, center)
    out = model_fn(x_pad)
    if isinstance(out, tuple):
        return tuple(crop_tensor(o, pad_amt) for o in out)
    return crop_tensor(out, pad_amt)


def pad_crop_forward(x, w, b, multiple, center=True, *, compute_dtype=None):
    """PadCropModule.forward with a 1x1-conv+ReLU inner model.

    Fast path (explicitly gated on the conv being pointwise): a 1x1 conv has no
    spatial receptive field, so pad + conv + crop of the same window == conv on the
    original data; run the fused Pallas kernel directly with no pad/crop HBM traffic.
    Otherwise fall back to the faithful pad -> model -> crop path."""
    if w.shape[2] == 1 and w.shape[3] == 1:
        return pointwise_conv_relu(x, w, b, compute_dtype=compute_dtype)
    model_fn = functools.partial(pointwise_conv_relu, w=w, b=b,
                                 compute_dtype=compute_dtype)
    return pad_crop_forward_generic(x, model_fn, multiple, center)


# ---------------------------------------------------------------------------
# Pure-JAX reference (explicit pad -> conv -> relu -> crop) for verification
# ---------------------------------------------------------------------------

def reference(x, w, b, multiple, center=True):
    N, C, H, W = x.shape
    ph = (-H) % multiple
    pw = (-W) % multiple
    if center:
        wl, wr, hl, hr = pw // 2, pw - pw // 2, ph // 2, ph - ph // 2
    else:
        wl, wr, hl, hr = 0, pw, 0, ph
    xp = jnp.pad(x, ((0, 0), (0, 0), (hl, hr), (wl, wr)))
    y = jax.lax.conv_general_dilated(
        xp, w, window_strides=(1, 1), padding="VALID",
        dimension_numbers=("NCHW", "OIHW", "NCHW"))
    y = jnp.maximum(y + b.reshape(1, -1, 1, 1), 0.0)
    Hp, Wp = H + ph, W + pw
    return y[:, :, hl:Hp - hr, wl:Wp - wr]


# ---------------------------------------------------------------------------

if __name__ == "__main__":
    key = jax.random.PRNGKey(0)
    kx, kw, kb = jax.random.split(key, 3)

    # Spatial dims deliberately NOT multiples of 8 so pad/crop is exercised, and
    # H*W=182 > tile_m=128 so the ragged (masked) last spatial tile is exercised.
    N, Cin, H, W = 2, 4, 13, 14
    Cout = 8
    multiple = 8
    center = True

    x = jax.random.normal(kx, (N, Cin, H, W), dtype=jnp.float32)
    w = jax.random.normal(kw, (Cout, Cin, 1, 1), dtype=jnp.float32) * 0.1  # Conv2d weight
    b = jax.random.normal(kb, (Cout,), dtype=jnp.float32) * 0.1            # Conv2d bias

    ref = reference(x, w, b, multiple, center)

    # Fast fused path (what the module uses for the pointwise inner model).
    out_fast = jax.block_until_ready(pad_crop_forward(x, w, b, multiple, center))
    assert out_fast.shape == (N, Cout, H, W), out_fast.shape
    assert jnp.allclose(out_fast, ref, rtol=1e-4, atol=1e-4), \
        f"fast path max abs err = {jnp.max(jnp.abs(out_fast - ref))}"

    # Generic pad -> Pallas model -> crop path (kept for spatially-extended models).
    model_fn = functools.partial(pointwise_conv_relu, w=w, b=b)
    out_generic = jax.block_until_ready(
        pad_crop_forward_generic(x, model_fn, multiple, center))
    assert out_generic.shape == (N, Cout, H, W), out_generic.shape
    assert jnp.allclose(out_generic, ref, rtol=1e-4, atol=1e-4), \
        f"generic path max abs err = {jnp.max(jnp.abs(out_generic - ref))}"

    # bf16 compute path (halves HBM read traffic; f32 MXU accumulate + f32 epilogue).
    out_bf16 = jax.block_until_ready(
        pad_crop_forward(x, w, b, multiple, center, compute_dtype=jnp.bfloat16))
    assert out_bf16.shape == (N, Cout, H, W), out_bf16.shape
    assert jnp.allclose(out_bf16, ref, rtol=5e-2, atol=5e-2), \
        f"bf16 path max abs err = {jnp.max(jnp.abs(out_bf16 - ref))}"

    print("KERNEL_OK")
</pallas_src>

<mosaic_0001>
module attributes {stable_mosaic.version = 11 : i64} {
  func.func @_conv_relu_kernel(%arg0: i32, %arg1: i32, %arg2: memref<8x4xf32, #tpu.memory_space<vmem>>, %arg3: memref<8x1xf32, #tpu.memory_space<vmem>>, %arg4: memref<1x4x128xf32, #tpu.memory_space<vmem>>, %arg5: memref<1x8x128xf32, #tpu.memory_space<vmem>>) attributes {dimension_semantics = [#tpu.dimension_semantics<parallel>, #tpu.dimension_semantics<parallel>], iteration_bounds = array<i64: 2, 2>, scalar_prefetch = 0 : i64, scratch_operands = 0 : i64, tpu.core_type = #tpu.core_type<tc>, window_params = [{pipeline_mode = #tpu.pipeline_mode<synchronous>, transform_indices = @transform_0, window_bounds = array<i64: 8, 4>}, {pipeline_mode = #tpu.pipeline_mode<synchronous>, transform_indices = @transform_1, window_bounds = array<i64: 8, 1>}, {transform_indices = @transform_2, window_bounds = array<i64: 1, 4, 128>}, {transform_indices = @transform_3, window_bounds = array<i64: 1, 8, 128>}]} {
    %c0 = arith.constant 0 : index
    %c0_0 = arith.constant 0 : index
    %0 = vector.load %arg2[%c0, %c0_0] : memref<8x4xf32, #tpu.memory_space<vmem>>, vector<8x4xf32>
    %c0_1 = arith.constant 0 : index
    %c0_2 = arith.constant 0 : index
    %c0_3 = arith.constant 0 : index
    %1 = vector.load %arg4[%c0_1, %c0_2, %c0_3] : memref<1x4x128xf32, #tpu.memory_space<vmem>>, vector<1x4x128xf32>
    %2 = vector.shape_cast %1 : vector<1x4x128xf32> to vector<4x128xf32>
    %cst = arith.constant dense<0.000000e+00> : vector<8x128xf32>
    %3 = tpu.matmul %0, %2, %cst {dimension_numbers = #tpu.dot_dimension_numbers<[1], [0], [0], [1], [0, 0, 1, 1], [], []>} : vector<8x4xf32>, vector<4x128xf32>, vector<8x128xf32> -> vector<8x128xf32>
    %c0_4 = arith.constant 0 : index
    %c0_5 = arith.constant 0 : index
    %4 = vector.load %arg3[%c0_4, %c0_5] : memref<8x1xf32, #tpu.memory_space<vmem>>, vector<8x1xf32>
    %5 = vector.broadcast %4 : vector<8x1xf32> to vector<8x128xf32>
    %6 = arith.addf %3, %5 : vector<8x128xf32>
    %cst_6 = arith.constant 0.000000e+00 : f32
    %7 = vector.broadcast %cst_6 : f32 to vector<8x128xf32>
    %8 = arith.maximumf %6, %7 : vector<8x128xf32>
    %c0_7 = arith.constant 0 : index
    %c0_8 = arith.constant 0 : index
    %c0_9 = arith.constant 0 : index
    %9 = vector.load %arg5[%c0_7, %c0_8, %c0_9] : memref<1x8x128xf32, #tpu.memory_space<vmem>>, vector<1x8x128xf32>
    %10 = vector.shape_cast %9 : vector<1x8x128xf32> to vector<8x128xf32>
    %11 = vector.shape_cast %8 : vector<8x128xf32> to vector<1x8x128xf32>
    tpu.vector_store %arg5[%c0_7, %c0_8, %c0_9], %11 {strides = array<i32>} : memref<1x8x128xf32, #tpu.memory_space<vmem>>, vector<1x8x128xf32>,
    return
  }
  func.func @transform_0(%arg0: i32, %arg1: i32) -> (i32, i32) {
    %c0_i32 = arith.constant 0 : i32
    %c0_i32_0 = arith.constant 0 : i32
    %c0_i32_1 = arith.constant 0 : i32
    return %c0_i32, %c0_i32_0 : i32, i32
  }
  func.func @transform_1(%arg0: i32, %arg1: i32) -> (i32, i32) {
    %c0_i32 = arith.constant 0 : i32
    %c0_i32_0 = arith.constant 0 : i32
    %c0_i32_1 = arith.constant 0 : i32
    return %c0_i32, %c0_i32_0 : i32, i32
  }
  func.func @transform_2(%arg0: i32, %arg1: i32) -> (i32, i32, i32) {
    %c0_i32 = arith.constant 0 : i32
    %c0_i32_0 = arith.constant 0 : i32
    return %arg0, %c0_i32, %arg1 : i32, i32, i32
  }
  func.func @transform_3(%arg0: i32, %arg1: i32) -> (i32, i32, i32) {
    %c0_i32 = arith.constant 0 : i32
    %c0_i32_0 = arith.constant 0 : i32
    return %arg0, %c0_i32, %arg1 : i32, i32, i32
  }
}

</mosaic_0001>

<bundles_post_ra>
// kernel: tpu_custom_call.1
= control target key start
LH: loop header
LB: loop body
LE: loop exit
PB: predicated region body
PF: predicated region fallthrough
CT: control target
= control target key end

     0   :  { %8 = vsyncpa [#allocation3], 0  ;;  %s661_s0 = inlined_call_operand.vmem [shape: f32[8,4], index: 0, kind: input, shape index: {}]   ;;  %s662_s1 = inlined_call_operand.vmem [shape: f32[8,1], index: 1, kind: input, shape index: {}]   ;;  %s663_s2 = inlined_call_operand.vmem [shape: f32[2,4,182], index: 2, kind: input, shape index: {}]   ;;  %s664_s3 = inlined_call_operand.hbm [shape: f32[2,8,182], index: 3, kind: output, shape index: {}]  }
   0x1   :  { %10 = vsyncpa [#allocation3 + $0x1], 0  ;;  %s533_s12 = smov 0   ;;  %s535_s13 = smov 0  }
   0x2   :  { %s537_s14 = smov 0   ;;  %s539_s15 = smov 0  }
   0x3   :  { %s541_s16 = smov 0   ;;  %s543_s17 = smov 0  }
   0x4   :  { %s545_s18 = smov 0   ;;  %s547_s19 = smov 0  }
   0x5 LB: > { %s328_s20 = sadd.s32 4294967295, %s510_s19   ;;  %s329_s21 = sadd.s32 4294967294, %s510_s19   ;;  %s510_s19 = sphi %s547_s19, %s16_s19   ;;  %s506_s18 = sphi %s545_s18, %s673_s18   ;;  %s502_s17 = sphi %s543_s17, %s672_s17   ;;  %s498_s16 = sphi %s541_s16, %s671_s16   ;;  %s494_s15 = sphi %s539_s15, %s670_s15   ;;  %s490_s14 = sphi %s537_s14, %s669_s14   ;;  %s486_s13 = sphi %s535_s13, %s668_s13   ;;  %s482_s12 = sphi %s533_s12, %s667_s12  }
   0x6   : > { %s25_s22 = sadd.s32 1, %s502_s17  ;;  %s28_s23 = sadd.s32 1, %s506_s18 }
   0x7   : > { %p26_p0 = scmp.ge.s32.totalorder %s25_s22, 2  ;;  %p117_p1 = scmp.ne.s32.totalorder %s490_s14, %s486_s13 }
   0x8   : > { %p118_p2 = scmp.eq.s32.totalorder %s328_s20, 3  ;;  %p123_p5 = scmp.ne.s32.totalorder %s486_s13, %s482_s12 }
   0x9   : > { %s675_s22 = smov (%p26_p0, %s25_s22), 0  ;;  %s677_s23 = smov (!%p26_p0, %s28_s23), %s506_s18 }
   0xa   : > { %s103_s24 = ssub.s32 %s502_s17, %s675_s22  ;;  %p584_p3 = por %p118_p2, %p117_p1 }
   0xb   : > { %p30_p4 = scmp.ge.s32.totalorder %s677_s23, 2  ;;  %p124_p6 = scmp.eq.s32.totalorder %s329_s21, 3 }
   0xc   : > { %p332_p7 = scmp.ge.s32.totalorder %s510_s19, 1  ;;  %p159_p9 = scmp.lt.s32.totalorder %s510_s19, 5 }
   0xd   : > { %s679_s23 = smov (%p30_p4, %s677_s23), 0  ;;  %p593_p8 = por %p124_p6, %p123_p5 }
   0xe   : > { %s102_s27 = ssub.s32 %s506_s18, %s679_s23  ;;  %s107_s28 = sadd.s32 1, %s490_s14 }
   0xf   : > { %s104_s29 = sor.u32 %s103_s24, %s102_s27  ;;  %p160_p10 = pnand %p332_p7, %p159_p9 }
  0x10   : > { %p105_p11 = scmp.eq.s32.totalorder %s104_s29, 0  ;;  %p186_p12 = scmp.lt.s32.totalorder (!%p160_p10), %s498_s16, 1 }
  0x11   : > { %163 = sbr.rel (%p160_p10) target bundleno = 163 (0xa3), region = 32  ;;  %p188_p13 = scmp.lt.s32.totalorder (!%p160_p10), %s494_s15, 1 }
  0x12   : > { %s602_s30 = scalar_select %p105_p11, %s490_s14, %s107_s28  }
  0x13   : > { %s339_s28 = sshll.u32 (!%p160_p10), %s498_s16, 1  ;;  %s183_s29 = sand.u32 (!%p160_p10), 1, %s486_s13  }
  0x14   : > { %s243_s4 = sadd.s32 (!%p160_p10), %s494_s15, %s339_s28  ;;  %s333_s5 = sshll.u32 (!%p160_p10), %s183_s29, 3 }
  0x15   : > { %s436_s28 = scalar_lea.hbm (!%p160_p10), %s664_s3, 32 }
  0x16   : > { %v512_v0 = vmov 0   ;;  %v196_v1 = vld [vmem:[%s662_s1] sm:$0xff]  ;;  %s187_s6 = scalar_select %p186_p12, %s498_s16, 1  ;;  %vm206_vm0 = vcmask 1043456   ;;  %vm202_vm1 = vcmask 31744  }
  0x17   : > { %415 = vset.pattern.permute.xlu0 %v512_v0  ;;  %s189_s7 = scalar_select %p188_p13, %s494_s15, 1  ;;  %v194_v2 = vld [vmem:[%s661_s0] sm:$0xff] }
  0x18   : > { %199 = vperm.xlu0 %415, %v196_v1   ;;  %s334_s8 = sshll.u32 %s187_s6, 1  ;;  %s340_s6 = sshll.u32 %s243_s4, 3 }
  0x19   : > { %s191_s9 = sadd.s32 %s334_s8, %s189_s7  ;;  %s233_s16 = scalar_lea.sflag [#allocation3], %s183_s29 }
  0x1a   : > { %s335_s10 = sshll.u32 %s191_s9, 2  ;;  %s245_s9 = scalar_lea.hbm %s664_s3, %s340_s6 }
  0x1b   : > { %s193_s21 = scalar_lea.vmem %s663_s2, %s335_s10  ;;  %s185_s10 = scalar_lea.vmem [#allocation2], %s333_s5 }
  0x1c   : > { %v195_v3 = vld [vmem:[%s193_s21] sm:$0xf]  ;;  %s247_s11 = sshll.u32 %s185_s10, 4  ;;  %s249_s20 = sshll.u32 %s245_s9, 4  ;;  %s248_s11 = int_to_ptr.vmem [resolvable:$true] %s247_s11  ;;  %s250_s20 = int_to_ptr.hbm [resolvable:$true] %s249_s20 }
  0x1d   : > { %336 = vmatpush.msk.msra.mxu0 %vm206_vm0, %v195_v3  ;;  %s430_s21 = sshra.s32 %s250_s20, 4  ;;  %s431_s21 = int_to_ptr.hbm [resolvable:$true] %s430_s21 }
  0x1e   : > { %337 = vmatmul.msk.f32.vlgmr.msra.gmra.mxu0 %vm202_vm1, %v194_v2  ;;  %s432_s15 = scalar_lea.hbm %s431_s21, 8  ;;  %p437_p4 = scmp.lt.s32.totalorder %s431_s21, %s664_s3 }
  0x1f   : > { %p433_p0 = scmp.ne.s32.totalorder %s431_s21, %s432_s15  ;;  %p438_p5 = scmp.lt.s32.totalorder %s436_s28, %s432_s15 }
  0x21   : > { %p434_p1 = pnand %p433_p0, %p584_p3  ;;  %p439_p6 = por %p438_p5, %p437_p4 }
  0x23   : > { %p435_p2 = pneg %p434_p1 }
  0x25   : > { %p440_p7 = pnand %p439_p6, %p435_p2 }
  0x8a   : > { %v200_v4 = vpop.permute.xlu0 %199 }
  0x9b   : > { %v227_v5 = vpop.f32.mrf.mxu0 }
  0x9c   : > { %v228_v6 = vadd.f32 %v227_v5, %v200_v4 }
  0x9e   : > { %v230_v7 = vmax.f32 %v228_v6, 0.0 }
  0xa0   : > { %231 = vst [vmem:[%s185_s10] sm:$0xff] %v230_v7 }
  0xa1   : > { %443 = shalt.err (!%p440_p7)
}
  0xa2   : > { %343 = dma.vmem_to_hbm [thread:$0]  (%p584_p3), %s248_s11, 128, %s250_s20, %s233_s16  }
  0xa3 PF: > { %p349_p9 = scmp.ge.s32.totalorder %s510_s19, 2  ;;  %s261_s29 = sand.u32 1, %s482_s12  }
  0xa4   : > { %s262_s6 = scalar_lea.sflag [#allocation3], %s261_s29 }
  0xa5   : > { %p346_p10 = pnand %p349_p9, %p593_p8 }
  0xa7   : > { %p347_p11 = pneg %p346_p10 }
  0xa9   : > { %477 = dma.done.wait (%p347_p11), %s262_s6, 128  }
  0xaa   : > { %479 = vsyncadd (%p347_p11), %s262_s6, 4294967168  ;;  %s16_s19 = sadd.s32 1, %s510_s19   ;;  %s667_s12 = smov %s486_s13 }
  0xab   : > { %p13_p12 = scmp.ge.s32.totalorder %s16_s19, 6   ;;  %s668_s13 = smov %s490_s14 }
  0xac   : > { %s669_s14 = smov %s602_s30  ;;  %s670_s15 = smov %s502_s17 }
  0xad   : > { %s671_s16 = smov %s506_s18  ;;  %s672_s17 = smov %s675_s22 }
  0xae   : > { %s673_s18 = smov %s679_s23  ;;  %15 = sbr.rel (!%p13_p12) target bundleno = 5 (0x5), region = 67 }
  0xb3   :  { %268 = vsyncpa [#allocation3], 1 }
  0xb4   :  { %270 = vsyncpa [#allocation3 + $0x1], 1 }

</bundles_post_ra>
